<compile_context>
chip_gen: v5e
topology: v5e:2x2
jax: 0.10.0
libtpu: 0.0.40
codegen_flags: <defaults>
</compile_context>

<pallas_src>
import jax
import jax.numpy as jnp
from jax.experimental import pallas as pl
from jax.experimental.pallas import tpu as pltpu

_LANE = 128      # vreg lane width  (last block dim must be 128-aligned or full)
_SUBLANE = 8     # vreg sublane width (second-to-last dim rule)

# VMEM plan: 1 input + 1 output, each double-buffered -> 4 live block buffers.
# Target ~4 MiB per block (<= 16 MiB of buffers) under a 32 MiB scoped limit:
# safe on v5e (128 MiB phys / 16 MiB default scoped -> raised explicitly),
# v6e (128 / 32 MiB) and v7x (64 / 32 MiB, 2 TCs).
_TARGET_BLOCK_BYTES = 4 << 20
_VMEM_LIMIT_BYTES = 32 << 20


def _flatten_copy_kernel(x_ref, o_ref):
    # Identity copy of the current (tn, tf) block.
    o_ref[...] = x_ref[...]


def _choose_tiles(N, F, itemsize):
    """Pick (tn, tf): lane/sublane-legal block dims sized from the VMEM budget."""
    # Batch tile: full batch when modest (full-dim blocks are always legal);
    # otherwise a sublane-aligned chunk so huge N doesn't squash the F tile.
    if N <= 256:
        tn = N
    else:
        tn = 256  # multiple of 8; uneven tail block handled by masked stores

    # Feature tile: multiple of 128, sized so one block is ~_TARGET_BLOCK_BYTES.
    if F <= _LANE:
        tf = F  # full dim -> legal even when < 128
    else:
        budget_tf = _TARGET_BLOCK_BYTES // max(1, tn * itemsize)
        budget_tf = max(_LANE, (budget_tf // _LANE) * _LANE)
        f_floor = (F // _LANE) * _LANE          # >= 128 here, keeps tf <= F
        tf = min(budget_tf, f_floor)
        # Keep >= 2 grid steps so v7x's second TensorCore gets work.
        if pl.cdiv(N, tn) * pl.cdiv(F, tf) <= 1 and tf >= 2 * _LANE:
            tf = (tf // 2 // _LANE) * _LANE
    return tn, tf


@jax.jit
def output_forward(x: jax.Array) -> jax.Array:
    """Equivalent of Output.forward: x.reshape(N, -1), produced by a Pallas copy."""
    N = x.shape[0]
    F = 1
    for d in x.shape[1:]:
        F *= d

    # Metadata-only flatten (same row-major element order as torch.reshape).
    x2d = jnp.reshape(x, (N, F))

    itemsize = jnp.dtype(x.dtype).itemsize
    tn, tf = _choose_tiles(N, F, itemsize)
    grid = (pl.cdiv(N, tn), pl.cdiv(F, tf))

    out = pl.pallas_call(
        _flatten_copy_kernel,
        out_shape=jax.ShapeDtypeStruct((N, F), x.dtype),
        grid=grid,
        in_specs=[pl.BlockSpec((tn, tf), lambda i, j: (i, j))],
        out_specs=pl.BlockSpec((tn, tf), lambda i, j: (i, j)),
        # Identity copy: let the kernel write in-place over the (reshaped)
        # input buffer when XLA can prove it safe -> halves HBM traffic.
        input_output_aliases={0: 0},
        compiler_params=pltpu.CompilerParams(
            dimension_semantics=("parallel", "parallel"),
            vmem_limit_bytes=_VMEM_LIMIT_BYTES,
        ),
        cost_estimate=pl.CostEstimate(
            flops=0,
            transcendentals=0,
            bytes_accessed=2 * N * F * itemsize,
        ),
    )(x2d)
    return out


if __name__ == "__main__":
    key = jax.random.PRNGKey(0)

    # Small NCHW input consistent with a conv-feature-map style tensor.
    x = jax.random.normal(key, (2, 4, 16, 16), dtype=jnp.float32)
    y = jax.block_until_ready(output_forward(x))
    ref = jnp.reshape(x, (x.shape[0], -1))
    assert y.shape == (2, 4 * 16 * 16), y.shape
    assert y.dtype == x.dtype
    assert bool(jnp.array_equal(y, ref)), "mismatch vs reference reshape"

    # Second shape with a non-128-aligned feature count (exercises the masked
    # tail block path).
    x2 = jax.random.normal(jax.random.PRNGKey(0), (2, 3, 10, 7), dtype=jnp.float32)
    y2 = jax.block_until_ready(output_forward(x2))
    ref2 = jnp.reshape(x2, (x2.shape[0], -1))
    assert y2.shape == (2, 3 * 10 * 7), y2.shape
    assert bool(jnp.array_equal(y2, ref2)), "mismatch vs reference reshape (tail case)"

    print("KERNEL_OK")
</pallas_src>

<mosaic_0001>
module attributes {stable_mosaic.version = 11 : i64} {
  func.func @_flatten_copy_kernel(%arg0: i32, %arg1: i32, %arg2: memref<2x512xf32, #tpu.memory_space<vmem>>, %arg3: memref<2x512xf32, #tpu.memory_space<vmem>>) attributes {dimension_semantics = [#tpu.dimension_semantics<parallel>, #tpu.dimension_semantics<parallel>], iteration_bounds = array<i64: 1, 2>, scalar_prefetch = 0 : i64, scratch_operands = 0 : i64, tpu.core_type = #tpu.core_type<tc>, window_params = [{transform_indices = @transform_0, window_bounds = array<i64: 2, 512>}, {transform_indices = @transform_1, window_bounds = array<i64: 2, 512>}]} {
    %c0 = arith.constant 0 : index
    %c0_0 = arith.constant 0 : index
    %0 = vector.load %arg2[%c0, %c0_0] : memref<2x512xf32, #tpu.memory_space<vmem>>, vector<2x512xf32>
    %c0_1 = arith.constant 0 : index
    %c0_2 = arith.constant 0 : index
    %1 = vector.load %arg3[%c0_1, %c0_2] : memref<2x512xf32, #tpu.memory_space<vmem>>, vector<2x512xf32>
    tpu.vector_store %arg3[%c0_1, %c0_2], %0 {strides = array<i32>} : memref<2x512xf32, #tpu.memory_space<vmem>>, vector<2x512xf32>,
    return
  }
  func.func @transform_0(%arg0: i32, %arg1: i32) -> (i32, i32) {
    %c0_i32 = arith.constant 0 : i32
    return %arg0, %arg1 : i32, i32
  }
  func.func @transform_1(%arg0: i32, %arg1: i32) -> (i32, i32) {
    %c0_i32 = arith.constant 0 : i32
    return %arg0, %arg1 : i32, i32
  }
}

</mosaic_0001>

<bundles_post_ra>
// kernel: output_forward.1
= control target key start
LH: loop header
LB: loop body
LE: loop exit
PB: predicated region body
PF: predicated region fallthrough
CT: control target
= control target key end

     0   :  { %6 = vsyncpa [#allocation3], 0  ;;  %s583_s0 = inlined_call_operand.hbm [shape: f32[2,1024], index: 0, kind: input, shape index: {}, may-alias: {0,1}]   ;;  %s584_s1 = inlined_call_operand.hbm [shape: f32[2,1024], index: 1, kind: output, shape index: {}, may-alias: {0,1}]  }
   0x1   :  { %8 = vsyncpa [#allocation3 + $0x1], 0 }
   0x2   :  { %9 = vsyncpa [#allocation4], 0 }
   0x3   :  { %11 = vsyncpa [#allocation4 + $0x1], 0  ;;  %s463_s6 = smov 0   ;;  %s465_s7 = smov 0  }
   0x4   :  { %s467_s8 = smov 0   ;;  %s469_s9 = smov 0  }
   0x5   :  { %s471_s10 = smov 0   ;;  %s473_s11 = smov 0  }
   0x6 LB: > { %s260_s12 = sadd.s32 4294967295, %s451_s11   ;;  %s261_s13 = sadd.s32 4294967294, %s451_s11   ;;  %s451_s11 = sphi %s473_s11, %s17_s11   ;;  %s447_s10 = sphi %s471_s10, %s593_s10   ;;  %s443_s9 = sphi %s469_s9, %s592_s9   ;;  %s439_s8 = sphi %s467_s8, %s591_s8   ;;  %s435_s7 = sphi %s465_s7, %s590_s7   ;;  %s431_s6 = sphi %s463_s6, %s589_s6  }
   0x7   : > { %s26_s14 = sadd.s32 1, %s447_s10  ;;  %s38_s15 = sadd.s32 1, %s439_s8 }
   0x8   : > { %p27_p0 = scmp.ge.s32.totalorder %s26_s14, 2  ;;  %p45_p1 = scmp.ne.s32.totalorder %s439_s8, %s435_s7 }
   0x9   : > { %p46_p2 = scmp.eq.s32.totalorder %s451_s11, 0  ;;  %p51_p3 = scmp.ne.s32.totalorder %s435_s7, %s431_s6 }
   0xa   : > { %s595_s14 = smov (%p27_p0, %s26_s14), 0  ;;  %p52_p5 = scmp.eq.s32.totalorder %s260_s12, 0 }
   0xb   : > { %p504_p4 = por %p46_p2, %p45_p1  ;;  %s34_s17 = ssub.s32 %s447_s10, %s595_s14 }
   0xc   : > { %p77_p6 = scmp.eq.s32.totalorder %s260_s12, 1  ;;  %p36_p7 = scmp.eq.s32.totalorder %s34_s17, 0 }
   0xd   : > { %p510_p8 = por %p52_p5, %p51_p3  ;;  %p83_p10 = scmp.eq.s32.totalorder %s261_s13, 1 }
   0xe   : > { %p514_p9 = por %p77_p6, %p45_p1  ;;  %p263_p12 = scmp.ge.s32.totalorder %s451_s11, 2 }
   0xf   : > { %s519_s20 = scalar_select %p36_p7, %s439_s8, %s38_s15  }
  0x10   : > { %p521_p11 = por %p83_p10, %p51_p3  ;;  %p289_p13 = scmp.lt.s32.totalorder %s451_s11, 2 }
  0x11   : > { %s103_s22 = sand.u32 1, %s439_s8   ;;  %s275_s24 = sshll.u32 %s447_s10, 3 }
  0x12   : > { %s264_s23 = sshll.u32 %s103_s22, 3  ;;  %s114_s27 = scalar_lea.hbm %s583_s0, %s275_s24 }
  0x13   : > { %s107_s28 = scalar_lea.vmem [#allocation2], %s264_s23  ;;  %s116_s30 = sshll.u32 %s114_s27, 4  ;;  %s117_s30 = int_to_ptr.hbm [resolvable:$true] %s116_s30 }
  0x14   : > { %s118_s29 = sshll.u32 %s107_s28, 4  ;;  %p282_p0 = pnand %p289_p13, %p504_p4  ;;  %s119_s29 = int_to_ptr.vmem [resolvable:$true] %s118_s29 }
  0x15   : > { %p267_p1 = scmp.ge.s32.totalorder %s451_s11, 1  ;;  %p123_p2 = scmp.lt.s32.totalorder %s451_s11, 3 }
  0x16   : > { %s104_s2 = scalar_lea.sflag [#allocation3], %s103_s22 }
  0x17   : > { %284 = dma.hbm_to_vmem [thread:$0]  (!%p282_p0), %s117_s30, 128, %s119_s29, %s104_s2  }
  0x18   : > { %p124_p3 = pnand %p267_p1, %p123_p2 }
  0x19   : > { %s537_s3 = sand.u32 (!%p124_p3), 1, %s435_s7  }
  0x1a   : > { %127 = sbr.rel (%p124_p3) target bundleno = 47 (0x2f), region = 24  ;;  %s268_s4 = sshll.u32 (!%p124_p3), %s537_s3, 3 }
  0x1b   : > { %s130_s5 = scalar_lea.sflag (!%p124_p3), [#allocation3], %s537_s3  ;;  %s133_s12 = scalar_lea.vmem (!%p124_p3), [#allocation2], %s268_s4 }
  0x1f   : > { %422 = dma.done.wait (%p510_p8), %s130_s5, 128  }
  0x20   : > { %424 = vsyncadd (%p510_p8), %s130_s5, 4294967168  ;;  %s276_s13 = sshll.u32 %s443_s9, 3  ;;  %s152_s22 = scalar_lea.vmem [#allocation5], %s268_s4  ;;  %v155_v0 = vld [vmem:[%s133_s12] sm:$0xff] }
  0x21   : > { %s171_s17 = scalar_lea.hbm %s584_s1, %s276_s13  ;;  %s173_s23 = sshll.u32 %s152_s22, 4  ;;  %156 = vst [vmem:[%s152_s22] sm:$0xff] %v155_v0  ;;  %s174_s23 = int_to_ptr.vmem [resolvable:$true] %s173_s23 }
  0x22   : > { %s175_s24 = sshll.u32 %s171_s17, 4  ;;  %s158_s25 = scalar_lea.sflag [#allocation4], %s537_s3  ;;  %s176_s24 = int_to_ptr.hbm [resolvable:$true] %s175_s24 }
  0x23   : > { %s383_s26 = sshra.s32 %s176_s24, 4  ;;  %s389_s28 = scalar_lea.hbm %s584_s1, 16  ;;  %s384_s26 = int_to_ptr.hbm [resolvable:$true] %s383_s26 }
  0x24   : > { %s385_s18 = scalar_lea.hbm %s384_s26, 8  ;;  %p390_p7 = scmp.lt.s32.totalorder %s384_s26, %s584_s1 }
  0x25   : > { %p386_p4 = scmp.ne.s32.totalorder %s384_s26, %s385_s18  ;;  %p391_p8 = scmp.lt.s32.totalorder %s389_s28, %s385_s18 }
  0x27   : > { %p387_p5 = pnand %p386_p4, %p514_p9  ;;  %p392_p10 = por %p391_p8, %p390_p7 }
  0x29   : > { %p388_p6 = pneg %p387_p5 }
  0x2b   : > { %p393_p13 = pnand %p392_p10, %p388_p6 }
  0x2d   : > { %396 = shalt.err (!%p393_p13)
}
  0x2e   : > { %279 = dma.vmem_to_hbm [thread:$0]  (%p514_p9), %s174_s23, 128, %s176_s24, %s158_s25  }
  0x2f PF: > { %s187_s2 = sand.u32 1, %s431_s6   ;;  %p286_p0 = pnand %p263_p12, %p521_p11 }
  0x30   : > { %s188_s3 = scalar_lea.sflag [#allocation4], %s187_s2 }
  0x31   : > { %p287_p1 = pneg %p286_p0 }
  0x33   : > { %426 = dma.done.wait (%p287_p1), %s188_s3, 128  }
  0x34   : > { %428 = vsyncadd (%p287_p1), %s188_s3, 4294967168  ;;  %s17_s11 = sadd.s32 1, %s451_s11   ;;  %s589_s6 = smov %s435_s7 }
  0x35   : > { %p14_p2 = scmp.ge.s32.totalorder %s17_s11, 4   ;;  %s590_s7 = smov %s439_s8 }
  0x36   : > { %s591_s8 = smov %s519_s20  ;;  %s592_s9 = smov %s447_s10 }
  0x37   : > { %s593_s10 = smov %s595_s14  ;;  %16 = sbr.rel (!%p14_p2) target bundleno = 6 (0x6), region = 69 }
  0x3c   :  { %194 = vsyncpa [#allocation3], 1 }
  0x3d   :  { %196 = vsyncpa [#allocation3 + $0x1], 1 }
  0x3e   :  { %197 = vsyncpa [#allocation4], 1 }
  0x3f   :  { %199 = vsyncpa [#allocation4 + $0x1], 1 }

</bundles_post_ra>
